<compile_context>
chip_gen: v5e
topology: v5e:2x2
jax: 0.10.0
libtpu: 0.0.40
codegen_flags: <defaults>
</compile_context>

<pallas_src>
import jax
import jax.numpy as jnp
from jax import lax
from jax.experimental import pallas as pl
from jax.experimental.pallas import tpu as pltpu


# --------------------------------------------------------------------------- #
# Small helpers: padding / tile selection / VMEM budgeting.
# --------------------------------------------------------------------------- #
def _round_up(x, m):
    return ((x + m - 1) // m) * m


def _vmem_budget_bytes():
    """~3/4 of physical VMEM: ~48 MiB on v7x (64 MiB/TC), ~96 MiB on v5e/v6e (128 MiB)."""
    phys = 64 * 1024 * 1024  # conservative fallback = v7x per-core VMEM
    try:
        phys = int(getattr(pltpu.get_tpu_info(), "vmem_capacity_bytes", phys))
    except Exception:
        pass
    return (phys * 3) // 4


def _pick_tile(padded_extent, desired):
    """Largest multiple of 128 that divides `padded_extent` and is <= desired."""
    best = 128
    t = 256
    top = min(desired, padded_extent)
    while t <= top:
        if padded_extent % t == 0:
            best = t
        t += 128
    return best


def _fit_tiles_to_vmem(tm, tn, tk, n_pad, e_pad, ab_bytes, budget):
    """Shrink tiles (keeping them divisors of the padded extents) until the
    double-buffered working set fits the VMEM budget."""
    def footprint(a, b, c):
        # 2 x (lhs tile + rhs tile) + 2 x resident f32 output tile
        return 2 * (a * c * ab_bytes + b * c * ab_bytes + a * b * 4)

    def shrink(t, extent):
        t -= 128
        while t >= 128 and extent % t:
            t -= 128
        return max(t, 128)

    while footprint(tm, tn, tk) > budget and (tm > 128 or tn > 128 or tk > 128):
        if tk >= max(tm, tn) and tk > 128:
            tk = shrink(tk, e_pad)
        elif tm >= tn and tm > 128:
            tm = shrink(tm, n_pad)
        else:
            tn = shrink(tn, n_pad)
    return tm, tn, tk


# --------------------------------------------------------------------------- #
# Kernel 1: edge weights as a lane-dense (1, E_pad) row.
#   ew[e] = sigmoid( sum_f uev[e, f] * w[f] + b )
#   uev is stored transposed (F, E_pad) with F unpadded; the reduction over F is a
#   VPU multiply + sublane reduce (XLU), so no unaligned-K MXU matmul is needed.
# --------------------------------------------------------------------------- #
def _edge_weight_kernel(w_ref, b_ref, uevT_ref, ew_ref):
    logits = jnp.sum(uevT_ref[...] * w_ref[...], axis=0, keepdims=True) + b_ref[0, 0]
    ew_ref[...] = jax.nn.sigmoid(logits)


def _edge_weight_call(uev_t, w_col, b_smem, tke, vmem_limit):
    F, E_pad = uev_t.shape
    cost = pl.CostEstimate(
        flops=2 * F * E_pad,
        transcendentals=E_pad,
        bytes_accessed=(F * E_pad + F + E_pad) * 4,
    )
    return pl.pallas_call(
        _edge_weight_kernel,
        out_shape=jax.ShapeDtypeStruct((1, E_pad), jnp.float32),
        grid=(E_pad // tke,),
        in_specs=[
            pl.BlockSpec((F, 1), lambda k: (0, 0)),                # weight column (full dims)
            pl.BlockSpec(memory_space=pltpu.MemorySpace.SMEM),     # bias scalar
            pl.BlockSpec((F, tke), lambda k: (0, k)),              # uev^T tile, F unpadded
        ],
        out_specs=pl.BlockSpec((1, tke), lambda k: (0, k)),
        compiler_params=pltpu.CompilerParams(
            dimension_semantics=("parallel",),
            vmem_limit_bytes=vmem_limit,
        ),
        cost_estimate=cost,
    )(w_col, b_smem, uev_t)


# --------------------------------------------------------------------------- #
# Kernel 2: e = (nem * ew_row) @ nem^T  ==  scaled_nem @ nem^T
#   Pure dot_general contracting the E axis of both operands (no in-kernel transpose).
#   Tiled (i, j, k), reduction axis last; accumulates directly into the resident f32
#   output block (index_map is k-invariant), no VMEM accumulator scratch.
# --------------------------------------------------------------------------- #
def _e_matrix_kernel(a_ref, b_ref, e_ref):
    @pl.when(pl.program_id(2) == 0)
    def _():
        e_ref[...] = jnp.zeros_like(e_ref)

    e_ref[...] += lax.dot_general(
        a_ref[...], b_ref[...],
        dimension_numbers=(((1,), (1,)), ((), ())),
        preferred_element_type=jnp.float32,
    )


def _e_matrix_call(scaled_nem, nem, tm, tn, tk, vmem_limit):
    N_pad, E_pad = nem.shape
    ab = jnp.dtype(nem.dtype).itemsize
    cost = pl.CostEstimate(
        flops=2 * N_pad * N_pad * E_pad,
        transcendentals=0,
        # include the N_pad/tn and N_pad/tm re-read factors of the two operands
        bytes_accessed=(N_pad * E_pad * ab * (N_pad // tn)
                        + N_pad * E_pad * ab * (N_pad // tm)
                        + N_pad * N_pad * 4),
    )
    return pl.pallas_call(
        _e_matrix_kernel,
        out_shape=jax.ShapeDtypeStruct((N_pad, N_pad), jnp.float32),
        grid=(N_pad // tm, N_pad // tn, E_pad // tk),
        in_specs=[
            pl.BlockSpec((tm, tk), lambda i, j, k: (i, k)),   # scaled_nem rows -> output rows
            pl.BlockSpec((tn, tk), lambda i, j, k: (j, k)),   # nem rows        -> output cols
        ],
        out_specs=pl.BlockSpec((tm, tn), lambda i, j, k: (i, j)),
        compiler_params=pltpu.CompilerParams(
            dimension_semantics=("parallel", "parallel", "arbitrary"),
            vmem_limit_bytes=vmem_limit,
        ),
        cost_estimate=cost,
    )(scaled_nem, nem)


# --------------------------------------------------------------------------- #
# Wrapper: padding / casting / diag(ew) folding + the two pallas_calls.
# --------------------------------------------------------------------------- #
def position_encoder_e_matrix(u_e_v_features, enc_w, enc_b, node_edge_matrix,
                              *, tile_mn=1024, tile_k=1024, tile_e1=8192,
                              use_bf16_matmul=True):
    """Returns (e, ew) with e: (N, N) f32, ew: (E,) f32.

    u_e_v_features   : (E, F) float32, F = 2*n_dim + e_dim
    enc_w            : (F, 1) float32 (torch Linear weight, transposed)
    enc_b            : (1, 1) float32
    node_edge_matrix : (N, E) float32 0/1 incidence
    tile_mn/tile_k   : target tile sizes for the e-matrix kernel; actual tiles are the
                       largest 128-multiples dividing the padded extents, then clamped to
                       the per-generation VMEM budget. (If both TensorCores of a v7x chip
                       should be used, pick tile_mn <= N_pad/2 so the (i,j) grid has >= 2 tiles.)
    use_bf16_matmul  : cast matmul operands to bf16 (incidence is exact; only ew is rounded),
                       f32 accumulation kept.
    """
    E, F = u_e_v_features.shape
    N, E2 = node_edge_matrix.shape
    assert E == E2 and E > 0, "empty edge set not handled by the Pallas path"

    budget = _vmem_budget_bytes()

    # ---- padding: decoupled from tile size (pad N and E to 128 only) ----------
    N_pad = _round_up(N, 128)
    E_pad = _round_up(E, 128)

    # ---- kernel 1: edge weights, one big lane-dense tile, F unpadded ----------
    tke = _pick_tile(E_pad, tile_e1)
    uev_t = jnp.pad(u_e_v_features.astype(jnp.float32).T, ((0, 0), (0, E_pad - E)))
    w_col = enc_w.reshape(F, 1).astype(jnp.float32)
    b_smem = enc_b.reshape(1, 1).astype(jnp.float32)
    ew_row = _edge_weight_call(uev_t, w_col, b_smem, tke,
                               min(budget, 32 * 1024 * 1024))          # (1, E_pad) f32

    # ---- fold diag(ew) into nem during the pad/cast pass (one O(N*E) pass) ----
    # Padded edge columns of nem are zero, so sigmoid(b) on padded edges is harmless.
    mm_dtype = jnp.bfloat16 if use_bf16_matmul else jnp.float32
    nem_pad = jnp.pad(node_edge_matrix.astype(jnp.float32),
                      ((0, N_pad - N), (0, E_pad - E)))
    scaled_nem = (nem_pad * ew_row).astype(mm_dtype)
    nem_rhs = nem_pad.astype(mm_dtype)                                  # 0/1 exact in bf16

    # ---- kernel 2: e = scaled_nem @ nem^T, big tiles, f32 resident accumulator --
    tm = _pick_tile(N_pad, tile_mn)
    tn = _pick_tile(N_pad, tile_mn)
    tk = _pick_tile(E_pad, tile_k)
    tm, tn, tk = _fit_tiles_to_vmem(tm, tn, tk, N_pad, E_pad,
                                    jnp.dtype(mm_dtype).itemsize, budget)
    e_pad = _e_matrix_call(scaled_nem, nem_rhs, tm, tn, tk, budget)     # (N_pad, N_pad) f32

    return e_pad[:N, :N], ew_row[0, :E]


def position_encoder_forward(v_features, e_features, us, vs, node_edge_matrix,
                             enc_w, enc_b, *, use_bf16_matmul=True, **tile_kwargs):
    """Glue: gather + concat in plain JAX, heavy math in Pallas kernels."""
    u_e_v = jnp.concatenate(
        [v_features[us], e_features, v_features[vs]], axis=1
    ).astype(jnp.float32)
    return position_encoder_e_matrix(
        u_e_v, enc_w, enc_b, node_edge_matrix,
        use_bf16_matmul=use_bf16_matmul, **tile_kwargs,
    )


if __name__ == "__main__":
    key = jax.random.PRNGKey(0)

    # Small synthetic graph: N nodes, E directed edges.
    n_dim, e_dim = 8, 6
    N, E = 16, 24
    F = 2 * n_dim + e_dim

    k1, k2, k3, k4, k5, k6 = jax.random.split(key, 6)
    v_features = jax.random.normal(k1, (N, n_dim), dtype=jnp.float32)
    e_features = jax.random.normal(k2, (E, e_dim), dtype=jnp.float32)
    us = jax.random.randint(k3, (E,), 0, N)
    vs = jax.random.randint(k4, (E,), 0, N)

    # node_edge_matrix as in AMPNN.produce_node_edge_matrix: 0/1 incidence.
    node_ids = jnp.arange(N)[:, None]
    node_edge_matrix = (
        (us[None, :] == node_ids) | (vs[None, :] == node_ids)
    ).astype(jnp.float32)

    # e_encoder params: Linear(n_dim + e_dim + n_dim, 1)
    enc_w = jax.random.normal(k5, (F, 1), dtype=jnp.float32) * 0.1
    enc_b = jax.random.normal(k6, (1, 1), dtype=jnp.float32) * 0.1

    # Pure-JAX reference.
    uev_ref = jnp.concatenate([v_features[us], e_features, v_features[vs]], axis=1)
    ew_ref = jax.nn.sigmoid(uev_ref @ enc_w + enc_b)[:, 0]
    e_ref = (node_edge_matrix * ew_ref[None, :]) @ node_edge_matrix.T

    # f32 path (exact).
    e_f32, ew_f32 = position_encoder_forward(
        v_features, e_features, us, vs, node_edge_matrix, enc_w, enc_b,
        use_bf16_matmul=False,
    )
    jax.block_until_ready((e_f32, ew_f32))
    assert jnp.allclose(ew_f32, ew_ref, atol=1e-4), "edge-weight mismatch (f32)"
    assert jnp.allclose(e_f32, e_ref, atol=1e-4), "e-matrix mismatch (f32)"

    # Default bf16-MXU path — only ew is rounded (~0.4% rel), relaxed tolerance.
    e_bf16, ew_bf16 = position_encoder_forward(
        v_features, e_features, us, vs, node_edge_matrix, enc_w, enc_b,
    )
    jax.block_until_ready((e_bf16, ew_bf16))
    assert jnp.allclose(ew_bf16, ew_ref, atol=1e-4), "edge-weight mismatch (bf16 path)"
    assert jnp.allclose(e_bf16, e_ref, atol=5e-2, rtol=5e-2), "e-matrix mismatch (bf16 path)"

    print("KERNEL_OK")
</pallas_src>

<mosaic_0001>
module attributes {stable_mosaic.version = 11 : i64} {
  func.func @_edge_weight_kernel(%arg0: i32, %arg1: memref<22x1xf32, #tpu.memory_space<vmem>>, %arg2: memref<1x1xf32, #tpu.memory_space<smem>>, %arg3: memref<22x128xf32, #tpu.memory_space<vmem>>, %arg4: memref<1x128xf32, #tpu.memory_space<vmem>>) attributes {dimension_semantics = [#tpu.dimension_semantics<parallel>], iteration_bounds = array<i64: 1>, scalar_prefetch = 0 : i64, scratch_operands = 0 : i64, tpu.core_type = #tpu.core_type<tc>, window_params = [{pipeline_mode = #tpu.pipeline_mode<synchronous>, transform_indices = @transform_0, window_bounds = array<i64: 22, 1>}, {transform_indices = @transform_1, window_bounds = array<i64: 1, 1>}, {transform_indices = @transform_2, window_bounds = array<i64: 22, 128>}, {transform_indices = @transform_3, window_bounds = array<i64: 1, 128>}]} {
    %c0 = arith.constant 0 : index
    %c0_0 = arith.constant 0 : index
    %0 = vector.load %arg3[%c0, %c0_0] : memref<22x128xf32, #tpu.memory_space<vmem>>, vector<22x128xf32>
    %c0_1 = arith.constant 0 : index
    %c0_2 = arith.constant 0 : index
    %1 = vector.load %arg1[%c0_1, %c0_2] : memref<22x1xf32, #tpu.memory_space<vmem>>, vector<22x1xf32>
    %2 = vector.broadcast %1 : vector<22x1xf32> to vector<22x128xf32>
    %3 = arith.mulf %0, %2 : vector<22x128xf32>
    %cst = arith.constant dense<0.000000e+00> : vector<128xf32>
    %4 = vector.multi_reduction <add>, %3, %cst [0] : vector<22x128xf32> to vector<128xf32>
    %5 = vector.shape_cast %4 : vector<128xf32> to vector<1x128xf32>
    %c0_3 = arith.constant 0 : index
    %c0_4 = arith.constant 0 : index
    %6 = memref.load %arg2[%c0_3, %c0_4] : memref<1x1xf32, #tpu.memory_space<smem>>
    %7 = vector.broadcast %6 : f32 to vector<1x128xf32>
    %8 = arith.addf %5, %7 : vector<1x128xf32>
    %9 = arith.negf %8 : vector<1x128xf32>
    %10 = math.exp %9 : vector<1x128xf32>
    %cst_5 = arith.constant 1.000000e+00 : f32
    %11 = vector.broadcast %cst_5 : f32 to vector<1x128xf32>
    %12 = arith.addf %11, %10 : vector<1x128xf32>
    %13 = arith.divf %11, %12 : vector<1x128xf32>
    %c0_6 = arith.constant 0 : index
    %c0_7 = arith.constant 0 : index
    %14 = vector.load %arg4[%c0_6, %c0_7] : memref<1x128xf32, #tpu.memory_space<vmem>>, vector<1x128xf32>
    tpu.vector_store %arg4[%c0_6, %c0_7], %13 {strides = array<i32>} : memref<1x128xf32, #tpu.memory_space<vmem>>, vector<1x128xf32>,
    return
  }
  func.func @transform_0(%arg0: i32) -> (i32, i32) {
    %c0_i32 = arith.constant 0 : i32
    %c0_i32_0 = arith.constant 0 : i32
    %c0_i32_1 = arith.constant 0 : i32
    return %c0_i32, %c0_i32_0 : i32, i32
  }
  func.func @transform_1(%arg0: i32) -> (i32, i32) {
    %c0_i32 = arith.constant 0 : i32
    %c0_i32_0 = arith.constant 0 : i32
    %c0_i32_1 = arith.constant 0 : i32
    return %c0_i32, %c0_i32_0 : i32, i32
  }
  func.func @transform_2(%arg0: i32) -> (i32, i32) {
    %c0_i32 = arith.constant 0 : i32
    %c0_i32_0 = arith.constant 0 : i32
    return %c0_i32, %arg0 : i32, i32
  }
  func.func @transform_3(%arg0: i32) -> (i32, i32) {
    %c0_i32 = arith.constant 0 : i32
    %c0_i32_0 = arith.constant 0 : i32
    return %c0_i32, %arg0 : i32, i32
  }
}

</mosaic_0001>

<bundles_post_ra>
// kernel: tpu_custom_call.1
= control target key start
LH: loop header
LB: loop body
LE: loop exit
PB: predicated region body
PF: predicated region fallthrough
CT: control target
= control target key end

     0   :  { %v124_v2 = vmov 0   ;;  %s170_s0 = inlined_call_operand.vmem [shape: f32[22,1], index: 0, kind: input, shape index: {}]   ;;  %s171_s1 = inlined_call_operand.<no memory space> [shape: f32[1,1], index: 1, kind: input, shape index: {}]   ;;  %s172_s2 = inlined_call_operand.vmem [shape: f32[22,128], index: 2, kind: input, shape index: {}]   ;;  %s173_s3 = inlined_call_operand.hbm [shape: f32[1,128], index: 3, kind: output, shape index: {}]  }
   0x1   :  { %v19_v0 = vld [vmem:[%s170_s0] sm:$0xff]  ;;  %v21_v1 = vld [vmem:[%s170_s0 + $0x10] sm:$0x3f]  ;;  %92 = vset.pattern.permute.xlu0 %v124_v2  ;;  %93 = vset.pattern.permute.xlu1 %v124_v2 }
   0x2   :  { %9 = vsyncpa [#allocation4], 0  ;;  %24 = vperm.xlu0 %92, %v19_v0   ;;  %34 = vperm.xlu1 %93, %v21_v1   ;;  %v20_v3 = vld [vmem:[%s170_s0 + $0x8] sm:$0xff]  ;;  %v18_v6 = vld [vmem:[%s172_s2 + $0x10] sm:$0x3f]  ;;  %vm41_vm0 = vcmask 1045504   ;;  %v51_v21 = vstv %s171_s1 }
   0x3   :  { %v16_v7 = vld [vmem:[%s172_s2] sm:$0xff]  ;;  %v17_v8 = vld [vmem:[%s172_s2 + $0x8] sm:$0xff]  ;;  %s125_s2 = smov [#allocation3]   ;;  %s80_s1 = sshll.u32 %s173_s3, 4  ;;  %s81_s1 = int_to_ptr.hbm [resolvable:$true] %s80_s1 }
   0x4   :  { %s78_s25 = sshll.u32 %s125_s2, 4  ;;  %s79_s25 = int_to_ptr.vmem [resolvable:$true] %s78_s25 }
   0xa   :  { %29 = vperm.xlu0 %92, %v20_v3  }
  0x74   :  { %v25_v4 = vpop.permute.xlu0 %24  ;;  %v35_v5 = vpop.permute.xlu1 %34 }
  0x75   :  { %v39_v9 = vmul.f32 %v35_v5, %v18_v6  ;;  %v37_v11 = vmul.f32 %v25_v4, %v16_v7 }
  0x77   :  { %v42_v13 = vsel %vm41_vm0, %v39_v9, 0.0 }
  0x7c   :  { %v30_v10 = vpop.permute.xlu0 %29 }
  0x7d   :  { %v38_v12 = vmul.f32 %v30_v10, %v17_v8 }
  0x7f   :  { %v40_v14 = vadd.f32 %v38_v12, %v37_v11 }
  0x81   :  { %v43_v15 = vadd.f32 %v42_v13, %v40_v14 }
  0x83   :  { %v44_v16 = vrot.slane %v43_v15, 4 }
  0x85   :  { %v45_v17 = vadd.f32 %v44_v16, %v43_v15 }
  0x87   :  { %v46_v18 = vrot.slane %v45_v17, 2 }
  0x89   :  { %v47_v19 = vadd.f32 %v46_v18, %v45_v17 }
  0x8b   :  { %v48_v20 = vrot.slane %v47_v19, 1 }
  0x8d   :  { %v49_v22 = vadd.f32 %v48_v20, %v47_v19 }
  0x8f   :  { %v52_v23 = vadd.f32 %v51_v21, %v49_v22 }
  0x91   :  { %v89_v24 = vmul.f32 -1.442695, %v52_v23 }
  0x93   :  { %94 = vpow2.f32 %v89_v24 }
  0x99   :  { %v95_v25 = vpop.eup %94 }
  0x9a   :  { %v56_v26 = vadd.f32 1.0, %v95_v25 }
  0x9c   :  { %96 = vrcp.f32 %v56_v26  ;;  %v68_v30 = vand.u32 2147483648, %v56_v26  ;;  %v66_v32 = vand.u32 2147483647, %v56_v26  ;;  %vm62_vm2 = vweird.f32 %v56_v26 }
  0x9e   :  { %v69_v34 = vor.u32 1.1754944e-38, %v68_v30  ;;  %vm67_vm4 = vcmp.eq.f32.partialorder %v66_v32, 8.507059e+37 }
  0xa2   :  { %v97_v27 = vpop.eup %96 }
  0xa3   :  { %v58_v28 = vmul.f32 %v97_v27, %v56_v26  ;;  %vm63_vm1 = vweird.f32 %v97_v27 }
  0xa4   :  { %vm64_vm3 = vmor %vm62_vm2, %vm63_vm1 }
  0xa5   :  { %v59_v29 = vsub.f32 1.0, %v58_v28 }
  0xa7   :  { %v60_v31 = vmul.f32 %v97_v27, %v59_v29 }
  0xa9   :  { %v61_v33 = vadd.f32 %v97_v27, %v60_v31 }
  0xab   :  { %v65_v35 = vsel %vm64_vm3, %v97_v27, %v61_v33 }
  0xac   :  { %v70_v36 = vsel %vm67_vm4, %v69_v34, %v65_v35 }
  0xad   :  { %72 = vst [vmem:[#allocation3] sm:$0x1] %v70_v36 }
  0xae   :  { %83 = dma.vmem_to_hbm [thread:$0]  %s79_s25, 16, %s81_s1, [#allocation4]  }
  0xaf   :  { %122 = dma.done.wait [#allocation4], 16  }
  0xb0   :  { %123 = vsyncadd [#allocation4], 4294967280 }
  0xb1   :  { %88 = vsyncpa [#allocation4], 1 }

</bundles_post_ra>
